<compile_context>
chip_gen: v6e
topology: v6e:2x2x1
jax: 0.10.0
libtpu: 0.0.40
codegen_flags: <defaults>
</compile_context>

<pallas_src>
import math
from typing import Optional

import jax
import jax.numpy as jnp
from jax.experimental import pallas as pl
from jax.experimental.pallas import tpu as pltpu


def _swiglu_hidden_dim(hidden_dim: int, multiple_of: int,
                       ffn_dim_multiplier: Optional[float] = None) -> int:
    hidden_dim = int(2 * hidden_dim / 3)
    if ffn_dim_multiplier is not None:
        hidden_dim = int(ffn_dim_multiplier * hidden_dim)
    hidden_dim = multiple_of * ((hidden_dim + multiple_of - 1) // multiple_of)
    return hidden_dim


def _round_up(a: int, b: int) -> int:
    return (a + b - 1) // b * b


def _swiglu_kernel(x_ref, w1_ref, w3_ref, w2_ref, o_ref, acc_ref):
    # grid = (M tiles, hidden tiles); hidden axis is the reduction axis (last).
    k = pl.program_id(1)

    @pl.when(k == 0)
    def _():
        acc_ref[...] = jnp.zeros_like(acc_ref)

    x = x_ref[...]                                              # (tm, dim_p)

    # Up-projections for this hidden tile on the MXU, f32 accumulation.
    h1 = jnp.dot(x, w1_ref[...], preferred_element_type=jnp.float32)  # (tm, th)
    h3 = jnp.dot(x, w3_ref[...], preferred_element_type=jnp.float32)  # (tm, th)

    # SwiGLU gate in f32: silu(h1) * h3 (sigmoid runs on the EUP).
    gated = (h1 * jax.nn.sigmoid(h1)) * h3

    # Partial down-projection, accumulated across hidden tiles.
    acc_ref[...] += jnp.dot(gated.astype(x.dtype), w2_ref[...],
                            preferred_element_type=jnp.float32)

    @pl.when(k == pl.num_programs(1) - 1)
    def _():
        o_ref[...] = acc_ref[...].astype(o_ref.dtype)


def _vmem_bytes(tm: int, th: int, dim_p: int, itemsize: int) -> int:
    # Double-buffered inputs/outputs + single f32 accumulator scratch.
    x_b = 2 * tm * dim_p * itemsize
    w_b = 2 * (2 * dim_p * th + th * dim_p) * itemsize
    o_b = 2 * tm * dim_p * itemsize
    acc = tm * dim_p * 4
    return x_b + w_b + o_b + acc


def swiglu_feedforward(x, w1, w3, w2, *, tm: int = 256, th: int = 512):
    """x: (..., dim). w1, w3: (dim, hidden) pre-transposed. w2: (hidden, dim)."""
    orig_shape = x.shape
    dim = orig_shape[-1]
    hidden = w1.shape[1]
    assert w1.shape == (dim, hidden)
    assert w3.shape == (dim, hidden)
    assert w2.shape == (hidden, dim)

    x2d = x.reshape(-1, dim)
    m = x2d.shape[0]
    itemsize = jnp.dtype(x2d.dtype).itemsize

    # --- choose TPU-friendly tile sizes -------------------------------------
    dim_p = _round_up(dim, 128)
    th = min(th, _round_up(hidden, 128))      # hidden tile, multiple of 128
    tm = min(tm, _round_up(m, 16))            # row tile, multiple of 16

    # Shrink tiles if the double-buffered working set would exceed ~40 MiB.
    VMEM_BUDGET = 40 * 1024 * 1024
    while _vmem_bytes(tm, th, dim_p, itemsize) > VMEM_BUDGET and th > 128:
        th //= 2
    while _vmem_bytes(tm, th, dim_p, itemsize) > VMEM_BUDGET and tm > 16:
        tm //= 2

    hidden_p = _round_up(hidden, th)
    m_p = _round_up(m, tm)

    # --- pad to lane-dense, tile-aligned shapes (no-ops when already aligned)
    if dim_p != dim:
        x2d = jnp.pad(x2d, ((0, 0), (0, dim_p - dim)))
        w1 = jnp.pad(w1, ((0, dim_p - dim), (0, 0)))
        w3 = jnp.pad(w3, ((0, dim_p - dim), (0, 0)))
        w2 = jnp.pad(w2, ((0, 0), (0, dim_p - dim)))
    if hidden_p != hidden:
        w1 = jnp.pad(w1, ((0, 0), (0, hidden_p - hidden)))
        w3 = jnp.pad(w3, ((0, 0), (0, hidden_p - hidden)))
        w2 = jnp.pad(w2, ((0, hidden_p - hidden), (0, 0)))
    if m_p != m:
        x2d = jnp.pad(x2d, ((0, m_p - m), (0, 0)))

    n_kt = hidden_p // th
    w_itemsize = jnp.dtype(w1.dtype).itemsize

    cost = pl.CostEstimate(
        flops=int(6 * m_p * dim_p * hidden_p),          # two up-proj + one down-proj
        transcendentals=int(m_p * hidden_p),            # sigmoid
        bytes_accessed=int(
            x2d.size * itemsize
            + (w1.size + w3.size + w2.size) * w_itemsize
            + m_p * dim_p * itemsize),
    )

    out = pl.pallas_call(
        _swiglu_kernel,
        out_shape=jax.ShapeDtypeStruct((m_p, dim_p), x.dtype),
        grid_spec=pltpu.PrefetchScalarGridSpec(
            num_scalar_prefetch=0,
            grid=(m_p // tm, n_kt),
            in_specs=[
                pl.BlockSpec((tm, dim_p), lambda i, k: (i, 0)),   # x row tile
                pl.BlockSpec((dim_p, th), lambda i, k: (0, k)),   # w1 column tile
                pl.BlockSpec((dim_p, th), lambda i, k: (0, k)),   # w3 column tile
                pl.BlockSpec((th, dim_p), lambda i, k: (k, 0)),   # w2 row tile
            ],
            out_specs=pl.BlockSpec((tm, dim_p), lambda i, k: (i, 0)),
            scratch_shapes=[pltpu.VMEM((tm, dim_p), jnp.float32)],  # f32 accumulator
        ),
        compiler_params=pltpu.CompilerParams(
            dimension_semantics=("parallel", "arbitrary"),
            vmem_limit_bytes=48 * 1024 * 1024,
        ),
        cost_estimate=cost,
    )(x2d, w1, w3, w2)

    out = out[:m, :dim]
    return out.reshape(orig_shape)


def init_swiglu_params(key, dim: int, hidden_dim: int, multiple_of: int,
                       ffn_dim_multiplier: Optional[float] = None,
                       dtype=jnp.float32):
    hidden = _swiglu_hidden_dim(hidden_dim, multiple_of, ffn_dim_multiplier)
    k1, k2, k3 = jax.random.split(key, 3)
    # nn.Linear default init: U(-1/sqrt(in_features), 1/sqrt(in_features)),
    # stored transposed as (in, out) for the kernel.
    b1 = 1.0 / math.sqrt(dim)
    b2 = 1.0 / math.sqrt(hidden)
    w1 = jax.random.uniform(k1, (dim, hidden), dtype, minval=-b1, maxval=b1)
    w3 = jax.random.uniform(k3, (dim, hidden), dtype, minval=-b1, maxval=b1)
    w2 = jax.random.uniform(k2, (hidden, dim), dtype, minval=-b2, maxval=b2)
    return w1, w3, w2, hidden


def swiglu_reference(x, w1, w3, w2):
    h1 = x @ w1
    h3 = x @ w3
    return (jax.nn.silu(h1) * h3) @ w2


if __name__ == "__main__":
    key = jax.random.PRNGKey(0)
    kx, kp, kx2, kp2 = jax.random.split(key, 4)

    # --- main test: lane-dense model-like dims (small) ----------------------
    batch, seq, dim = 2, 8, 128
    hidden_dim_arg, multiple_of = 384, 128        # -> hidden = 256
    x = jax.random.normal(kx, (batch, seq, dim), dtype=jnp.float32)
    w1, w3, w2, hidden = init_swiglu_params(kp, dim, hidden_dim_arg, multiple_of)

    y = jax.block_until_ready(swiglu_feedforward(x, w1, w3, w2))
    y_ref = swiglu_reference(x, w1, w3, w2)
    assert y.shape == (batch, seq, dim)
    assert jnp.allclose(y, y_ref, atol=1e-5, rtol=1e-5), "f32 mismatch vs reference"

    # bf16 path (fast MXU dtype; f32 accumulation inside the kernel).
    xb, w1b, w3b, w2b = (a.astype(jnp.bfloat16) for a in (x, w1, w3, w2))
    yb = jax.block_until_ready(swiglu_feedforward(xb, w1b, w3b, w2b))
    yb_ref = swiglu_reference(xb.astype(jnp.float32), w1b.astype(jnp.float32),
                              w3b.astype(jnp.float32), w2b.astype(jnp.float32))
    assert jnp.allclose(yb.astype(jnp.float32), yb_ref, atol=5e-2, rtol=5e-2), \
        "bf16 mismatch vs reference"

    # --- ragged / unaligned test: exercises M, hidden and dim padding -------
    x2 = jax.random.normal(kx2, (1, 5, 96), dtype=jnp.float32)
    w1r, w3r, w2r, _ = init_swiglu_params(kp2, 96, 96, 64)   # hidden = 64
    y2 = jax.block_until_ready(swiglu_feedforward(x2, w1r, w3r, w2r))
    y2_ref = swiglu_reference(x2, w1r, w3r, w2r)
    assert y2.shape == x2.shape
    assert jnp.allclose(y2, y2_ref, atol=1e-5, rtol=1e-5), "padded-case mismatch"

    print("KERNEL_OK")
</pallas_src>

<mosaic_0001>
module attributes {stable_mosaic.version = 11 : i64} {
  func.func @_swiglu_kernel(%arg0: i32, %arg1: i32, %arg2: memref<16x128xf32, #tpu.memory_space<vmem>>, %arg3: memref<128x256xf32, #tpu.memory_space<vmem>>, %arg4: memref<128x256xf32, #tpu.memory_space<vmem>>, %arg5: memref<256x128xf32, #tpu.memory_space<vmem>>, %arg6: memref<16x128xf32, #tpu.memory_space<vmem>>, %arg7: memref<16x128xf32, #tpu.memory_space<vmem>>) attributes {dimension_semantics = [#tpu.dimension_semantics<parallel>, #tpu.dimension_semantics<arbitrary>], iteration_bounds = array<i64: 1, 1>, scalar_prefetch = 0 : i64, scratch_operands = 1 : i64, tpu.core_type = #tpu.core_type<tc>, window_params = [{transform_indices = @transform_0, window_bounds = array<i64: 16, 128>}, {transform_indices = @transform_1, window_bounds = array<i64: 128, 256>}, {transform_indices = @transform_2, window_bounds = array<i64: 128, 256>}, {transform_indices = @transform_3, window_bounds = array<i64: 256, 128>}, {transform_indices = @transform_4, window_bounds = array<i64: 16, 128>}]} {
    %c0_i32 = arith.constant 0 : i32
    %0 = arith.cmpi eq, %arg1, %c0_i32 : i32
    %1 = arith.extui %0 : i1 to i32
    %c0_i32_0 = arith.constant 0 : i32
    %2 = arith.cmpi ne, %1, %c0_i32_0 : i32
    scf.if %2 {
      %cst_17 = arith.constant 0.000000e+00 : f32
      %23 = vector.broadcast %cst_17 : f32 to vector<16x128xf32>
      %c0_18 = arith.constant 0 : index
      %c0_19 = arith.constant 0 : index
      %24 = vector.load %arg7[%c0_18, %c0_19] : memref<16x128xf32, #tpu.memory_space<vmem>>, vector<16x128xf32>
      tpu.vector_store %arg7[%c0_18, %c0_19], %23 {strides = array<i32>} : memref<16x128xf32, #tpu.memory_space<vmem>>, vector<16x128xf32>,
    } else {
    }
    %c0 = arith.constant 0 : index
    %c0_1 = arith.constant 0 : index
    %3 = vector.load %arg2[%c0, %c0_1] : memref<16x128xf32, #tpu.memory_space<vmem>>, vector<16x128xf32>
    %c0_2 = arith.constant 0 : index
    %c0_3 = arith.constant 0 : index
    %4 = vector.load %arg3[%c0_2, %c0_3] : memref<128x256xf32, #tpu.memory_space<vmem>>, vector<128x256xf32>
    %cst = arith.constant dense<0.000000e+00> : vector<16x256xf32>
    %5 = tpu.matmul %3, %4, %cst {dimension_numbers = #tpu.dot_dimension_numbers<[1], [0], [0], [1], [0, 0, 1, 1], [], []>} : vector<16x128xf32>, vector<128x256xf32>, vector<16x256xf32> -> vector<16x256xf32>
    %c0_4 = arith.constant 0 : index
    %c0_5 = arith.constant 0 : index
    %6 = vector.load %arg4[%c0_4, %c0_5] : memref<128x256xf32, #tpu.memory_space<vmem>>, vector<128x256xf32>
    %cst_6 = arith.constant dense<0.000000e+00> : vector<16x256xf32>
    %7 = tpu.matmul %3, %6, %cst_6 {dimension_numbers = #tpu.dot_dimension_numbers<[1], [0], [0], [1], [0, 0, 1, 1], [], []>} : vector<16x128xf32>, vector<128x256xf32>, vector<16x256xf32> -> vector<16x256xf32>
    %8 = arith.negf %5 : vector<16x256xf32>
    %9 = math.exp %8 : vector<16x256xf32>
    %cst_7 = arith.constant 1.000000e+00 : f32
    %10 = vector.broadcast %cst_7 : f32 to vector<16x256xf32>
    %11 = arith.addf %10, %9 : vector<16x256xf32>
    %12 = arith.divf %10, %11 : vector<16x256xf32>
    %13 = arith.mulf %5, %12 : vector<16x256xf32>
    %14 = arith.mulf %13, %7 : vector<16x256xf32>
    %c0_8 = arith.constant 0 : index
    %c0_9 = arith.constant 0 : index
    %15 = vector.load %arg7[%c0_8, %c0_9] : memref<16x128xf32, #tpu.memory_space<vmem>>, vector<16x128xf32>
    %c0_10 = arith.constant 0 : index
    %c0_11 = arith.constant 0 : index
    %16 = vector.load %arg5[%c0_10, %c0_11] : memref<256x128xf32, #tpu.memory_space<vmem>>, vector<256x128xf32>
    %cst_12 = arith.constant dense<0.000000e+00> : vector<16x128xf32>
    %17 = tpu.matmul %14, %16, %cst_12 {dimension_numbers = #tpu.dot_dimension_numbers<[1], [0], [0], [1], [0, 0, 1, 1], [], []>} : vector<16x256xf32>, vector<256x128xf32>, vector<16x128xf32> -> vector<16x128xf32>
    %18 = arith.addf %15, %17 : vector<16x128xf32>
    %c0_13 = arith.constant 0 : index
    %c0_14 = arith.constant 0 : index
    %19 = vector.load %arg7[%c0_13, %c0_14] : memref<16x128xf32, #tpu.memory_space<vmem>>, vector<16x128xf32>
    tpu.vector_store %arg7[%c0_13, %c0_14], %18 {strides = array<i32>} : memref<16x128xf32, #tpu.memory_space<vmem>>, vector<16x128xf32>,
    %c0_i32_15 = arith.constant 0 : i32
    %20 = arith.cmpi eq, %arg1, %c0_i32_15 : i32
    %21 = arith.extui %20 : i1 to i32
    %c0_i32_16 = arith.constant 0 : i32
    %22 = arith.cmpi ne, %21, %c0_i32_16 : i32
    scf.if %22 {
      %c0_17 = arith.constant 0 : index
      %c0_18 = arith.constant 0 : index
      %23 = vector.load %arg7[%c0_17, %c0_18] : memref<16x128xf32, #tpu.memory_space<vmem>>, vector<16x128xf32>
      %c0_19 = arith.constant 0 : index
      %c0_20 = arith.constant 0 : index
      %24 = vector.load %arg6[%c0_19, %c0_20] : memref<16x128xf32, #tpu.memory_space<vmem>>, vector<16x128xf32>
      tpu.vector_store %arg6[%c0_19, %c0_20], %23 {strides = array<i32>} : memref<16x128xf32, #tpu.memory_space<vmem>>, vector<16x128xf32>,
    } else {
    }
    return
  }
  func.func @transform_0(%arg0: i32, %arg1: i32) -> (i32, i32) {
    %c0_i32 = arith.constant 0 : i32
    %c0_i32_0 = arith.constant 0 : i32
    return %arg0, %c0_i32 : i32, i32
  }
  func.func @transform_1(%arg0: i32, %arg1: i32) -> (i32, i32) {
    %c0_i32 = arith.constant 0 : i32
    %c0_i32_0 = arith.constant 0 : i32
    return %c0_i32, %arg1 : i32, i32
  }
  func.func @transform_2(%arg0: i32, %arg1: i32) -> (i32, i32) {
    %c0_i32 = arith.constant 0 : i32
    %c0_i32_0 = arith.constant 0 : i32
    return %c0_i32, %arg1 : i32, i32
  }
  func.func @transform_3(%arg0: i32, %arg1: i32) -> (i32, i32) {
    %c0_i32 = arith.constant 0 : i32
    %c0_i32_0 = arith.constant 0 : i32
    return %arg1, %c0_i32 : i32, i32
  }
  func.func @transform_4(%arg0: i32, %arg1: i32) -> (i32, i32) {
    %c0_i32 = arith.constant 0 : i32
    %c0_i32_0 = arith.constant 0 : i32
    return %arg0, %c0_i32 : i32, i32
  }
}

</mosaic_0001>

<bundles_post_ra>
// kernel: tpu_custom_call.1
= control target key start
LH: loop header
LB: loop body
LE: loop exit
PB: predicated region body
PF: predicated region fallthrough
CT: control target
= control target key end

     0   :  { %9 = vsyncpa [#allocation4], 0  ;;  %s747_s0 = inlined_call_operand.hbm [shape: f32[16,128], index: 0, kind: input, shape index: {}]   ;;  %s748_s1 = inlined_call_operand.hbm [shape: f32[128,256], index: 1, kind: input, shape index: {}]   ;;  %s749_s2 = inlined_call_operand.hbm [shape: f32[128,256], index: 2, kind: input, shape index: {}]   ;;  %s750_s3 = inlined_call_operand.hbm [shape: f32[256,128], index: 3, kind: input, shape index: {}]   ;;  %s751_s4 = inlined_call_operand.hbm [shape: f32[16,128], index: 4, kind: output, shape index: {}]  }
   0x1   :  { %10 = vsyncpa [#allocation7], 0 }
   0x2   :  { %11 = vsyncpa [#allocation10], 0 }
   0x3   :  { %12 = vsyncpa [#allocation5], 0  ;;  %s678_s15 = smov [#allocation6]  }
   0x4   :  { %s30_s16 = sshll.u32 %s678_s15, 4  ;;  %s31_s16 = int_to_ptr.vmem [resolvable:$true] %s30_s16 }
   0x5   :  { %s578_s17 = scalar_lea.vmem %s31_s16, 4096  ;;  %p583_p1 = scmp.lt.s32.totalorder %s31_s16, %s31_s16 }
   0x6   :  { %p579_p0 = scmp.ne.s32.totalorder %s31_s16, %s578_s17  ;;  %p584_p2 = scmp.lt.s32.totalorder %s578_s17, %s578_s17 }
   0x8   :  { %p585_p3 = por %p584_p2, %p583_p1 }
   0xa   :  { %p586_p4 = pnand %p585_p3, %p579_p0 }
   0xc   :  { %589 = shalt.err (!%p586_p4)
}
   0xd   :  { %s679_s18 = smov 256   ;;  %s680_s19 = smov 16  }
   0xe   :  { %36 = dma.hbm_to_vmem [thread:$0]  %s748_s1, 4096, %s31_s16, [#allocation7], %s679_s18, %s679_s18, %s680_s19  }
   0xf   :  { %s681_s22 = smov [#allocation3]  }
  0x10   :  { %s18_s23 = sshll.u32 %s681_s22, 4  ;;  %s19_s23 = int_to_ptr.vmem [resolvable:$true] %s18_s23 }
  0x11   :  { %s598_s24 = scalar_lea.vmem %s19_s23, 256  ;;  %p603_p6 = scmp.lt.s32.totalorder %s19_s23, %s19_s23 }
  0x12   :  { %p599_p5 = scmp.ne.s32.totalorder %s19_s23, %s598_s24  ;;  %p604_p7 = scmp.lt.s32.totalorder %s598_s24, %s598_s24 }
  0x14   :  { %p605_p8 = por %p604_p7, %p603_p6 }
  0x16   :  { %p606_p9 = pnand %p605_p8, %p599_p5 }
  0x18   :  { %609 = shalt.err (!%p606_p9)
}
  0x19   :  { %s682_s25 = smov 128   ;;  %s683_s26 = smov 8  }
  0x1a   :  { %24 = dma.hbm_to_vmem [thread:$0]  %s747_s0, 256, %s19_s23, [#allocation4], %s682_s25, %s682_s25, %s683_s26  }
  0x1b   :  { %s684_s1 = smov [#allocation8]   ;;  %s685_s30 = smov [#allocation9]  }
  0x1c   :  { %s42_s29 = sshll.u32 %s684_s1, 4  ;;  %s54_s5 = sshll.u32 %s685_s30, 4  ;;  %s43_s29 = int_to_ptr.vmem [resolvable:$true] %s42_s29  ;;  %s55_s5 = int_to_ptr.vmem [resolvable:$true] %s54_s5 }
  0x1d   :  { %s618_s6 = scalar_lea.vmem %s43_s29, 4096  ;;  %p623_p11 = scmp.lt.s32.totalorder %s43_s29, %s43_s29 }
  0x1e   :  { %p619_p10 = scmp.ne.s32.totalorder %s43_s29, %s618_s6  ;;  %p624_p12 = scmp.lt.s32.totalorder %s618_s6, %s618_s6 }
  0x20   :  { %p625_p13 = por %p624_p12, %p623_p11 }
  0x22   :  { %p626_p0 = pnand %p625_p13, %p619_p10 }
  0x24   :  { %629 = shalt.err (!%p626_p0)
}
  0x25   :  { %48 = dma.hbm_to_vmem [thread:$0]  %s749_s2, 4096, %s43_s29, [#allocation7], %s679_s18, %s679_s18, %s680_s19  }
  0x26   :  { %s638_s0 = scalar_lea.vmem %s55_s5, 4096  ;;  %p643_p2 = scmp.lt.s32.totalorder %s55_s5, %s55_s5 }
  0x27   :  { %p639_p1 = scmp.ne.s32.totalorder %s55_s5, %s638_s0  ;;  %p644_p3 = scmp.lt.s32.totalorder %s638_s0, %s638_s0 }
  0x29   :  { %p645_p4 = por %p644_p3, %p643_p2 }
  0x2b   :  { %p646_p5 = pnand %p645_p4, %p639_p1 }
  0x2d   :  { %649 = shalt.err (!%p646_p5)
}
  0x2e   :  { %60 = dma.hbm_to_vmem [thread:$0]  %s750_s3, 4096, %s55_s5, [#allocation10], %s682_s25, %s682_s25, %s683_s26  }
  0x2f   :  { %670 = dma.done.wait [#allocation4], 256  }
  0x30   :  { %671 = vsyncadd [#allocation4], 4294967040 }
  0x31   :  { %672 = dma.done.wait [#allocation7], 8192  }
  0x32   :  { %673 = vsyncadd [#allocation7], 4294959104 }
  0x33   :  { %674 = dma.done.wait [#allocation10], 4096  }
  0x34   :  { %675 = vsyncadd [#allocation10], 4294963200  ;;  %v686_v0 = vmov 0.0   ;;  %v112_v1 = vld [vmem:[#allocation6 + $0xf8] sm:$0xff]  ;;  %v111_v2 = vld [vmem:[#allocation6 + $0xf0] sm:$0xff]  ;;  %s687_s2 = smov [#allocation11]  }
  0x35   :  { %177 = vmatprep.mubr.f32.mxu0 %v686_v0  ;;  %286 = vmatprep.mubr.f32.mxu1 %v686_v0  ;;  %v110_v3 = vld [vmem:[#allocation6 + $0xe8] sm:$0xff]  ;;  %v109_v4 = vld [vmem:[#allocation6 + $0xe0] sm:$0xff]  ;;  %v108_v5 = vld [vmem:[#allocation6 + $0xd8] sm:$0xff]  ;;  %s456_s3 = sshll.u32 %s687_s2, 4  ;;  %s457_s3 = int_to_ptr.vmem [resolvable:$true] %s456_s3 }
  0x36   :  { %113 = vmatprep.subr.mxu0 %v112_v1  ;;  %v107_v6 = vld [vmem:[#allocation6 + $0xd0] sm:$0xff]  ;;  %v106_v7 = vld [vmem:[#allocation6 + $0xc8] sm:$0xff]  ;;  %v105_v8 = vld [vmem:[#allocation6 + $0xc0] sm:$0xff]  ;;  %s650_s11 = scalar_lea.vmem %s457_s3, 256  ;;  %p655_p7 = scmp.lt.s32.totalorder %s457_s3, %s457_s3 }
  0x37   :  { %114 = vmatpush1.msra.mxu0 %v111_v2  ;;  %v104_v9 = vld [vmem:[#allocation6 + $0xb8] sm:$0xff]  ;;  %v103_v10 = vld [vmem:[#allocation6 + $0xb0] sm:$0xff]  ;;  %v102_v11 = vld [vmem:[#allocation6 + $0xa8] sm:$0xff]  ;;  %p651_p6 = scmp.ne.s32.totalorder %s457_s3, %s650_s11  ;;  %p656_p8 = scmp.lt.s32.totalorder %s650_s11, %s650_s11 }
  0x38   :  { %115 = vmatprep.subr.mxu0 %v110_v3  ;;  %v101_v12 = vld [vmem:[#allocation6 + $0xa0] sm:$0xff]  ;;  %v100_v13 = vld [vmem:[#allocation6 + $0x98] sm:$0xff]  ;;  %v99_v14 = vld [vmem:[#allocation6 + $0x90] sm:$0xff] }
  0x39   :  { %116 = vmatpush1.msra.mxu0 %v109_v4  ;;  %v221_v15 = vld [vmem:[#allocation8 + $0xf8] sm:$0xff]  ;;  %v220_v16 = vld [vmem:[#allocation8 + $0xf0] sm:$0xff]  ;;  %v219_v17 = vld [vmem:[#allocation8 + $0xe8] sm:$0xff]  ;;  %p657_p9 = por %p656_p8, %p655_p7 }
  0x3a   :  { %117 = vmatprep.subr.mxu0 %v108_v5  ;;  %v98_v18 = vld [vmem:[#allocation6 + $0x88] sm:$0xff]  ;;  %222 = vmatprep.subr.mxu1 %v221_v15  ;;  %v218_v19 = vld [vmem:[#allocation8 + $0xe0] sm:$0xff]  ;;  %v217_v21 = vld [vmem:[#allocation8 + $0xd8] sm:$0xff] }
  0x3b   :  { %118 = vmatpush1.msra.mxu0 %v107_v6  ;;  %v97_v20 = vld [vmem:[#allocation6 + $0x80] sm:$0xff]  ;;  %223 = vmatpush1.msra.mxu1 %v220_v16  ;;  %v96_v22 = vld [vmem:[#allocation6 + $0x78] sm:$0xff]  ;;  %v216_v23 = vld [vmem:[#allocation8 + $0xd0] sm:$0xff]  ;;  %p658_p10 = pnand %p657_p9, %p651_p6 }
  0x3c   :  { %119 = vmatprep.subr.mxu0 %v106_v7  ;;  %224 = vmatprep.subr.mxu1 %v219_v17  ;;  %v95_v24 = vld [vmem:[#allocation6 + $0x70] sm:$0xff]  ;;  %v215_v25 = vld [vmem:[#allocation8 + $0xc8] sm:$0xff]  ;;  %v214_v27 = vld [vmem:[#allocation8 + $0xc0] sm:$0xff] }
  0x3d   :  { %120 = vmatpush1.msra.mxu0 %v105_v8  ;;  %225 = vmatpush1.msra.mxu1 %v218_v19  ;;  %v94_v26 = vld [vmem:[#allocation6 + $0x68] sm:$0xff]  ;;  %v93_v28 = vld [vmem:[#allocation6 + $0x60] sm:$0xff]  ;;  %v213_v29 = vld [vmem:[#allocation8 + $0xb8] sm:$0xff] }
  0x3e   :  { %121 = vmatprep.subr.mxu0 %v104_v9  ;;  %226 = vmatprep.subr.mxu1 %v217_v21  ;;  %v92_v30 = vld [vmem:[#allocation6 + $0x58] sm:$0xff]  ;;  %v212_v31 = vld [vmem:[#allocation8 + $0xb0] sm:$0xff]  ;;  %v211_v33 = vld [vmem:[#allocation8 + $0xa8] sm:$0xff] }
  0x3f   :  { %122 = vmatpush1.msra.mxu0 %v103_v10  ;;  %227 = vmatpush1.msra.mxu1 %v216_v23  ;;  %v91_v32 = vld [vmem:[#allocation6 + $0x50] sm:$0xff]  ;;  %v90_v34 = vld [vmem:[#allocation6 + $0x48] sm:$0xff]  ;;  %v210_v35 = vld [vmem:[#allocation8 + $0xa0] sm:$0xff] }
  0x40   :  { %123 = vmatprep.subr.mxu0 %v102_v11  ;;  %228 = vmatprep.subr.mxu1 %v215_v25  ;;  %v89_v36 = vld [vmem:[#allocation6 + $0x40] sm:$0xff]  ;;  %v209_v37 = vld [vmem:[#allocation8 + $0x98] sm:$0xff]  ;;  %v208_v39 = vld [vmem:[#allocation8 + $0x90] sm:$0xff] }
  0x41   :  { %124 = vmatpush1.msra.mxu0 %v101_v12  ;;  %229 = vmatpush1.msra.mxu1 %v214_v27  ;;  %v88_v38 = vld [vmem:[#allocation6 + $0x38] sm:$0xff]  ;;  %v87_v40 = vld [vmem:[#allocation6 + $0x30] sm:$0xff]  ;;  %v207_v41 = vld [vmem:[#allocation8 + $0x88] sm:$0xff] }
  0x42   :  { %125 = vmatprep.subr.mxu0 %v100_v13  ;;  %230 = vmatprep.subr.mxu1 %v213_v29  ;;  %v86_v42 = vld [vmem:[#allocation6 + $0x28] sm:$0xff]  ;;  %v206_v43 = vld [vmem:[#allocation8 + $0x80] sm:$0xff]  ;;  %v205_v45 = vld [vmem:[#allocation8 + $0x78] sm:$0xff] }
  0x43   :  { %126 = vmatpush1.msra.mxu0 %v99_v14  ;;  %231 = vmatpush1.msra.mxu1 %v212_v31  ;;  %v85_v44 = vld [vmem:[#allocation6 + $0x20] sm:$0xff]  ;;  %v84_v46 = vld [vmem:[#allocation6 + $0x18] sm:$0xff]  ;;  %v204_v47 = vld [vmem:[#allocation8 + $0x70] sm:$0xff] }
  0x44   :  { %127 = vmatprep.subr.mxu0 %v98_v18  ;;  %232 = vmatprep.subr.mxu1 %v211_v33  ;;  %v83_v48 = vld [vmem:[#allocation6 + $0x10] sm:$0xff]  ;;  %v203_v49 = vld [vmem:[#allocation8 + $0x68] sm:$0xff]  ;;  %v202_v51 = vld [vmem:[#allocation8 + $0x60] sm:$0xff] }
  0x45   :  { %128 = vmatpush1.msra.mxu0 %v97_v20  ;;  %233 = vmatpush1.msra.mxu1 %v210_v35  ;;  %v82_v50 = vld [vmem:[#allocation6 + $0x8] sm:$0xff]  ;;  %v81_v52 = vld [vmem:[#allocation6] sm:$0xff]  ;;  %v201_v53 = vld [vmem:[#allocation8 + $0x58] sm:$0xff] }
  0x46   :  { %129 = vmatprep.subr.mxu0 %v96_v22  ;;  %234 = vmatprep.subr.mxu1 %v209_v37  ;;  %v79_v54 = vld [vmem:[#allocation3] sm:$0xff]  ;;  %v199_v56 = vld [vmem:[#allocation8 + $0x48] sm:$0xff]  ;;  %v198_v57 = vld [vmem:[#allocation8 + $0x40] sm:$0xff] }
  0x47   :  { %130 = vmatpush1.msra.mxu0 %v95_v24  ;;  %235 = vmatpush1.msra.mxu1 %v208_v39  ;;  %v200_v55 = vld [vmem:[#allocation8 + $0x50] sm:$0xff]  ;;  %v197_v58 = vld [vmem:[#allocation8 + $0x38] sm:$0xff]  ;;  %v195_v61 = vld [vmem:[#allocation8 + $0x28] sm:$0xff] }
  0x48   :  { %131 = vmatprep.subr.mxu0 %v94_v26  ;;  %236 = vmatprep.subr.mxu1 %v207_v41  ;;  %v80_v59 = vld [vmem:[#allocation3 + $0x8] sm:$0xff]  ;;  %v196_v60 = vld [vmem:[#allocation8 + $0x30] sm:$0xff]  ;;  %v194_v62 = vld [vmem:[#allocation8 + $0x20] sm:$0xff] }
  0x49   :  { %132 = vmatpush1.msra.mxu0 %v93_v28  ;;  %237 = vmatpush1.msra.mxu1 %v206_v43  ;;  %v193_v63 = vld [vmem:[#allocation8 + $0x18] sm:$0xff]  ;;  %v192_v1 = vld [vmem:[#allocation8 + $0x10] sm:$0xff]  ;;  %v191_v2 = vld [vmem:[#allocation8 + $0x8] sm:$0xff] }
  0x4a   :  { %133 = vmatprep.subr.mxu0 %v92_v30  ;;  %238 = vmatprep.subr.mxu1 %v205_v45  ;;  %v190_v3 = vld [vmem:[#allocation8] sm:$0xff]  ;;  %v364_v4 = vld [vmem:[#allocation9 + $0xf8] sm:$0xff]  ;;  %v363_v6 = vld [vmem:[#allocation9 + $0xf0] sm:$0xff] }
  0x4b   :  { %134 = vmatpush1.msra.mxu0 %v91_v32  ;;  %239 = vmatpush1.msra.mxu1 %v204_v47  ;;  %v348_v5 = vld [vmem:[#allocation9 + $0x78] sm:$0xff]  ;;  %v347_v7 = vld [vmem:[#allocation9 + $0x70] sm:$0xff]  ;;  %v362_v8 = vld [vmem:[#allocation9 + $0xe8] sm:$0xff] }
  0x4c   :  { %135 = vmatprep.subr.mxu0 %v90_v34  ;;  %240 = vmatprep.subr.mxu1 %v203_v49  ;;  %v346_v9 = vld [vmem:[#allocation9 + $0x68] sm:$0xff]  ;;  %v361_v10 = vld [vmem:[#allocation9 + $0xe0] sm:$0xff]  ;;  %v360_v11 = vld [vmem:[#allocation9 + $0xd8] sm:$0xff] }
  0x4d   :  { %136 = vmatpush1.msra.mxu0 %v89_v36  ;;  %241 = vmatpush1.msra.mxu1 %v202_v51  ;;  %v344_v12 = vld [vmem:[#allocation9 + $0x58] sm:$0xff]  ;;  %v359_v13 = vld [vmem:[#allocation9 + $0xd0] sm:$0xff]  ;;  %v358_v15 = vld [vmem:[#allocation9 + $0xc8] sm:$0xff] }
  0x4e   :  { %137 = vmatprep.subr.mxu0 %v88_v38  ;;  %242 = vmatprep.subr.mxu1 %v201_v53  ;;  %v343_v14 = vld [vmem:[#allocation9 + $0x50] sm:$0xff]  ;;  %v342_v16 = vld [vmem:[#allocation9 + $0x48] sm:$0xff]  ;;  %v357_v17 = vld [vmem:[#allocation9 + $0xc0] sm:$0xff] }
  0x4f   :  { %138 = vmatpush1.msra.mxu0 %v87_v40  ;;  %243 = vmatpush1.msra.mxu1 %v200_v55  ;;  %v341_v18 = vld [vmem:[#allocation9 + $0x40] sm:$0xff]  ;;  %v356_v19 = vld [vmem:[#allocation9 + $0xb8] sm:$0xff]  ;;  %v355_v21 = vld [vmem:[#allocation9 + $0xb0] sm:$0xff] }
  0x50   :  { %139 = vmatprep.subr.mxu0 %v86_v42  ;;  %244 = vmatprep.subr.mxu1 %v199_v56  ;;  %v340_v20 = vld [vmem:[#allocation9 + $0x38] sm:$0xff]  ;;  %v339_v22 = vld [vmem:[#allocation9 + $0x30] sm:$0xff]  ;;  %v354_v23 = vld [vmem:[#allocation9 + $0xa8] sm:$0xff] }
  0x51   :  { %140 = vmatpush1.msra.mxu0 %v85_v44  ;;  %245 = vmatpush1.msra.mxu1 %v198_v57  ;;  %v338_v24 = vld [vmem:[#allocation9 + $0x28] sm:$0xff]  ;;  %v353_v25 = vld [vmem:[#allocation9 + $0xa0] sm:$0xff]  ;;  %v352_v27 = vld [vmem:[#allocation9 + $0x98] sm:$0xff] }
  0x52   :  { %141 = vmatprep.subr.mxu0 %v84_v46  ;;  %246 = vmatprep.subr.mxu1 %v197_v58  ;;  %v337_v26 = vld [vmem:[#allocation9 + $0x20] sm:$0xff]  ;;  %v336_v28 = vld [vmem:[#allocation9 + $0x18] sm:$0xff]  ;;  %v351_v29 = vld [vmem:[#allocation9 + $0x90] sm:$0xff] }
  0x53   :  { %142 = vmatpush1.msra.mxu0 %v83_v48  ;;  %247 = vmatpush1.msra.mxu1 %v196_v60  ;;  %v335_v30 = vld [vmem:[#allocation9 + $0x10] sm:$0xff]  ;;  %v350_v31 = vld [vmem:[#allocation9 + $0x88] sm:$0xff]  ;;  %v349_v33 = vld [vmem:[#allocation9 + $0x80] sm:$0xff] }
  0x54   :  { %143 = vmatprep.subr.mxu0 %v82_v50  ;;  %248 = vmatprep.subr.mxu1 %v195_v61  ;;  %v334_v32 = vld [vmem:[#allocation9 + $0x8] sm:$0xff]  ;;  %v333_v34 = vld [vmem:[#allocation9] sm:$0xff] }
  0x55   :  { %144 = vmatpush1.msra.mxu0 %v81_v52  ;;  %249 = vmatpush1.msra.mxu1 %v194_v62 }
  0x56   :  { %178 = vmatmul.mubr.f32.vlgmr.msra.gmra.mxu0 %v79_v54  ;;  %250 = vmatprep.subr.mxu1 %v193_v63 }
  0x57   :  { %183 = vmatprep.mubr.f32.mxu0 %v686_v0  ;;  %251 = vmatpush1.msra.mxu1 %v192_v1 }
  0x58   :  { %252 = vmatprep.subr.mxu1 %v191_v2  ;;  %474 = vmatprep.subr.mxu0 %v364_v4 }
  0x59   :  { %253 = vmatpush1.msra.mxu1 %v190_v3  ;;  %475 = vmatpush3.msra.mxu0 %v348_v5 }
  0x5a   :  { %184 = vmatmul.mubr.f32.gmra.mxu0 %v80_v59  ;;  %287 = vmatmul.mubr.f32.vlgmr.msra.gmra.mxu1 %v79_v54 }
  0x5b   :  { %292 = vmatprep.mubr.f32.mxu1 %v686_v0  ;;  %512 = vmatprep.subr.mxu1 %v364_v4  ;;  %v345_v0 = vld [vmem:[#allocation9 + $0x60] sm:$0xff] }
  0x5c   :  { %528 = vmatpush3.msra.mxu1 %v348_v5  ;;  %476 = vmatprep.subr.mxu0 %v363_v6 }
  0x5d   :  { %513 = vmatprep.subr.mxu1 %v363_v6  ;;  %477 = vmatpush3.msra.mxu0 %v347_v7 }
  0x5e   :  { %293 = vmatmul.mubr.f32.gmra.mxu1 %v80_v59  ;;  %478 = vmatprep.subr.mxu0 %v362_v8 }
  0x5f   :  { %529 = vmatpush3.msra.mxu1 %v347_v7  ;;  %479 = vmatpush3.msra.mxu0 %v346_v9 }
  0x60   :  { %514 = vmatprep.subr.mxu1 %v362_v8  ;;  %480 = vmatprep.subr.mxu0 %v361_v10 }
  0x61   :  { %530 = vmatpush3.msra.mxu1 %v346_v9  ;;  %481 = vmatpush3.msra.mxu0 %v345_v0 }
  0x62   :  { %515 = vmatprep.subr.mxu1 %v361_v10  ;;  %482 = vmatprep.subr.mxu0 %v360_v11 }
  0x63   :  { %531 = vmatpush3.msra.mxu1 %v345_v0  ;;  %483 = vmatpush3.msra.mxu0 %v344_v12 }
  0x64   :  { %516 = vmatprep.subr.mxu1 %v360_v11  ;;  %484 = vmatprep.subr.mxu0 %v359_v13 }
  0x65   :  { %532 = vmatpush3.msra.mxu1 %v344_v12  ;;  %485 = vmatpush3.msra.mxu0 %v343_v14 }
  0x66   :  { %517 = vmatprep.subr.mxu1 %v359_v13  ;;  %486 = vmatprep.subr.mxu0 %v358_v15 }
  0x67   :  { %533 = vmatpush3.msra.mxu1 %v343_v14  ;;  %487 = vmatpush3.msra.mxu0 %v342_v16 }
  0x68   :  { %518 = vmatprep.subr.mxu1 %v358_v15  ;;  %488 = vmatprep.subr.mxu0 %v357_v17 }
  0x69   :  { %534 = vmatpush3.msra.mxu1 %v342_v16  ;;  %489 = vmatpush3.msra.mxu0 %v341_v18 }
  0x6a   :  { %519 = vmatprep.subr.mxu1 %v357_v17  ;;  %490 = vmatprep.subr.mxu0 %v356_v19 }
  0x6b   :  { %535 = vmatpush3.msra.mxu1 %v341_v18  ;;  %491 = vmatpush3.msra.mxu0 %v340_v20 }
  0x6c   :  { %520 = vmatprep.subr.mxu1 %v356_v19  ;;  %492 = vmatprep.subr.mxu0 %v355_v21 }
  0x6d   :  { %536 = vmatpush3.msra.mxu1 %v340_v20  ;;  %493 = vmatpush3.msra.mxu0 %v339_v22 }
  0x6e   :  { %521 = vmatprep.subr.mxu1 %v355_v21  ;;  %494 = vmatprep.subr.mxu0 %v354_v23 }
  0x6f   :  { %537 = vmatpush3.msra.mxu1 %v339_v22  ;;  %495 = vmatpush3.msra.mxu0 %v338_v24 }
  0x70   :  { %522 = vmatprep.subr.mxu1 %v354_v23  ;;  %496 = vmatprep.subr.mxu0 %v353_v25 }
  0x71   :  { %538 = vmatpush3.msra.mxu1 %v338_v24  ;;  %497 = vmatpush3.msra.mxu0 %v337_v26 }
  0x72   :  { %523 = vmatprep.subr.mxu1 %v353_v25  ;;  %498 = vmatprep.subr.mxu0 %v352_v27 }
  0x73   :  { %539 = vmatpush3.msra.mxu1 %v337_v26  ;;  %499 = vmatpush3.msra.mxu0 %v336_v28 }
  0x74   :  { %524 = vmatprep.subr.mxu1 %v352_v27  ;;  %500 = vmatprep.subr.mxu0 %v351_v29 }
  0x75   :  { %540 = vmatpush3.msra.mxu1 %v336_v28  ;;  %501 = vmatpush3.msra.mxu0 %v335_v30 }
  0x76   :  { %525 = vmatprep.subr.mxu1 %v351_v29  ;;  %502 = vmatprep.subr.mxu0 %v350_v31 }
  0x77   :  { %541 = vmatpush3.msra.mxu1 %v335_v30  ;;  %503 = vmatpush3.msra.mxu0 %v334_v32 }
  0x78   :  { %526 = vmatprep.subr.mxu1 %v350_v31  ;;  %504 = vmatprep.subr.mxu0 %v349_v33 }
  0x79   :  { %542 = vmatpush3.msra.mxu1 %v334_v32  ;;  %505 = vmatpush3.msra.mxu0 %v333_v34 }
  0x7a   :  { %527 = vmatprep.subr.mxu1 %v349_v33 }
  0x7b   :  { %543 = vmatpush3.msra.mxu1 %v333_v34 }
 0x116   :  { %v179_v35 = vpop.f32.mrf.mxu0 }
 0x117   :  { %v470_v36 = vmul.f32 -1.442695, %v179_v35 }
 0x118   :  { %v181_v37 = vpop.f32.mrf.mxu0 }
 0x119   :  { %554 = vpow2.f32 %v470_v36  ;;  %v471_v38 = vmul.f32 -1.442695, %v181_v37 }
 0x11a   :  { %v185_v39 = vpop.f32.mrf.mxu0  ;;  %v288_v51 = vpop.f32.mrf.mxu1 }
 0x11b   :  { %556 = vpow2.f32 %v471_v38  ;;  %v472_v40 = vmul.f32 -1.442695, %v185_v39 }
 0x11c   :  { %v187_v41 = vpop.f32.mrf.mxu0  ;;  %v290_v53 = vpop.f32.mrf.mxu1 }
 0x11d   :  { %558 = vpow2.f32 %v472_v40  ;;  %v473_v42 = vmul.f32 -1.442695, %v187_v41 }
 0x11e   :  { %v294_v58 = vpop.f32.mrf.mxu1 }
 0x11f   :  { %560 = vpow2.f32 %v473_v42 }
 0x120   :  { %v296_v1 = vpop.f32.mrf.mxu1 }
 0x126   :  { %v555_v43 = vpop.eup %554 }
 0x127   :  { %v311_v44 = vadd.f32 1.0, %v555_v43 }
 0x128   :  { %v557_v45 = vpop.eup %556 }
 0x129   :  { %562 = vrcp.f32 %v311_v44  ;;  %v312_v46 = vadd.f32 1.0, %v557_v45 }
 0x12a   :  { %v559_v47 = vpop.eup %558 }
 0x12b   :  { %564 = vrcp.f32 %v312_v46  ;;  %v313_v48 = vadd.f32 1.0, %v559_v47 }
 0x12c   :  { %v561_v49 = vpop.eup %560 }
 0x12d   :  { %566 = vrcp.f32 %v313_v48  ;;  %v314_v50 = vadd.f32 1.0, %v561_v49 }
 0x12f   :  { %568 = vrcp.f32 %v314_v50 }
 0x136   :  { %v563_v52 = vpop.eup %562 }
 0x137   :  { %v323_v55 = vmul.f32 %v563_v52, %v179_v35 }
 0x138   :  { %v565_v54 = vpop.eup %564 }
 0x139   :  { %v324_v56 = vmul.f32 %v565_v54, %v181_v37  ;;  %v327_v62 = vmul.f32 %v323_v55, %v288_v51 }
 0x13a   :  { %v567_v57 = vpop.eup %566 }
 0x13b   :  { %v328_v59 = vmul.f32 %v324_v56, %v290_v53  ;;  %v325_v61 = vmul.f32 %v567_v57, %v185_v39 }
 0x13c   :  { %v569_v60 = vpop.eup %568 }
 0x13d   :  { %v326_v63 = vmul.f32 %v569_v60, %v187_v41  ;;  %429 = vmatprep.mubr.f32.mxu0 %v328_v59  ;;  %v329_v3 = vmul.f32 %v325_v61, %v294_v58 }
 0x13e   :  { %430 = vmatmul.mubr.f32.vlgmr.msra.gmra.mxu0 %v327_v62 }
 0x13f   :  { %v330_v2 = vmul.f32 %v326_v63, %v296_v1 }
 0x141   :  { %434 = vmatprep.mubr.f32.mxu1 %v330_v2 }
 0x142   :  { %435 = vmatmul.mubr.f32.vlgmr.msra.gmra.mxu1 %v329_v3 }
 0x1fe   :  { %v506_v4 = vpop.f32.mrf.mxu0 }
 0x200   :  { %v507_v5 = vpop.f32.mrf.mxu0 }
 0x201   :  { %v508_v6 = vadd.f32 %v507_v5, %v506_v4 }
 0x202   :  { %v509_v7 = vpop.f32.mrf.mxu1 }
 0x203   :  { %449 = vst [vmem:[#allocation11] sm:$0xff] %v508_v6 }
 0x204   :  { %v510_v8 = vpop.f32.mrf.mxu1 }
 0x205   :  { %v511_v9 = vadd.f32 %v510_v8, %v509_v7 }
 0x207   :  { %450 = vst [vmem:[#allocation11 + $0x8] sm:$0xff] %v511_v9 }
 0x208   :  { %661 = shalt.err (!%p658_p10)
}
 0x209   :  { %462 = dma.vmem_to_hbm [thread:$0]  %s457_s3, 256, %s751_s4, [#allocation5], %s682_s25, %s682_s25, %s683_s26  }
 0x20a   :  { %676 = dma.done.wait [#allocation5], 256  }
 0x20b   :  { %677 = vsyncadd [#allocation5], 4294967040 }
 0x20c   :  { %466 = vsyncpa [#allocation4], 1 }
 0x20d   :  { %467 = vsyncpa [#allocation7], 1 }
 0x20e   :  { %468 = vsyncpa [#allocation10], 1 }
 0x20f   :  { %469 = vsyncpa [#allocation5], 1 }

</bundles_post_ra>
